<compile_context>
chip_gen: v7x
topology: tpu7x:2x2x1
jax: 0.10.0
libtpu: 0.0.40
codegen_flags: <defaults>
</compile_context>

<pallas_src>
import math
import numpy as np
import jax
import jax.numpy as jnp
from jax.experimental import pallas as pl
from jax.experimental.pallas import tpu as pltpu

# ---- small synthetic encoder config (BERT-like) ------------------------------
B = 2           # batch
S = 8           # sequence length
H = 32          # hidden size (context_hdim)
NH = 2          # attention heads
HD = H // NH    # head dim
FFN = 64        # FFN intermediate size
VOCAB = 100     # vocab size
VOCAB_PAD = 128 # vocab padded to lane width for an aligned one-hot matmul
T = B * S       # flattened token count
MW = S          # max words per example (padded; real word count <= S)
LN_EPS = 1e-12
NEG_INF = -1e9


def _layernorm(v, g, b, eps=LN_EPS):
    mu = jnp.mean(v, axis=-1, keepdims=True)
    var = jnp.mean((v - mu) ** 2, axis=-1, keepdims=True)
    return (v - mu) * jax.lax.rsqrt(var + eps) * g + b


# ------------------------------ Pallas kernel ---------------------------------
def _context_encoder_kernel(ids_ref, bias_ref, pool_ref,
                            tok_emb_ref, pos_ref, lnv_ref,
                            wqkv_ref, bqkv_ref, wo_ref,
                            w1_ref, b1_ref, w2_ref,
                            out_ref):
    f32 = jnp.float32

    # packed (8, H) LayerNorm gains/biases + attention/FFN output biases
    lnv = lnv_ref[...]
    emb_g, emb_b = lnv[0:1], lnv[1:2]
    bo, g1, be1 = lnv[2:3], lnv[3:4], lnv[4:5]
    b2, g2, be2 = lnv[5:6], lnv[6:7], lnv[7:8]

    # --- fused embedding lookup: one-hot gather on the MXU + pos + LayerNorm --
    ids = ids_ref[...]                                              # (T, 1) int32
    vocab_iota = jax.lax.broadcasted_iota(jnp.int32, (T, VOCAB_PAD), 1)
    onehot = (vocab_iota == ids).astype(f32)                        # (T, 128)
    x = jnp.dot(onehot, tok_emb_ref[...], preferred_element_type=f32)
    x = x + pos_ref[...]                                            # (T, H)
    x = _layernorm(x, emb_g, emb_b)

    # --- multi-head self-attention (head-major weights, no lane slice/concat) -
    scale = 1.0 / math.sqrt(HD)
    bias = bias_ref[...]                                            # (T, T)
    attn = jnp.zeros((T, H), f32)
    for h in range(NH):                                             # static unroll
        qh = jnp.dot(x, wqkv_ref[h], preferred_element_type=f32) + bqkv_ref[h]
        kh = jnp.dot(x, wqkv_ref[NH + h], preferred_element_type=f32) + bqkv_ref[NH + h]
        vh = jnp.dot(x, wqkv_ref[2 * NH + h], preferred_element_type=f32) + bqkv_ref[2 * NH + h]
        s = jax.lax.dot_general(qh, kh, (((1,), (1,)), ((), ())),
                                preferred_element_type=f32) * scale + bias   # (T, T)
        s = s - jnp.max(s, axis=-1, keepdims=True)                  # stable softmax
        p = jnp.exp(s)
        p = p * pl.reciprocal(jnp.sum(p, axis=-1, keepdims=True))   # exact recip-mul
        ctx = jnp.dot(p, vh, preferred_element_type=f32)            # (T, HD)
        # concat(ctx_h) @ Wo == sum_h ctx_h @ Wo[h]  -> no lane-axis concat
        attn = attn + jnp.dot(ctx, wo_ref[h], preferred_element_type=f32)
    h1 = _layernorm(x + attn + bo, g1, be1)                         # (T, H)

    # --- feed-forward ----------------------------------------------------------
    ff = jnp.dot(h1, w1_ref[...], preferred_element_type=f32) + b1_ref[...]
    ff = jax.nn.gelu(ff, approximate=True)
    ff = jnp.dot(ff, w2_ref[...], preferred_element_type=f32) + b2
    h2 = _layernorm(h1 + ff, g2, be2)                               # (T, H)

    # --- output_mask subword -> word average pooling (process_encoder_outputs) -
    out_ref[...] = jnp.dot(pool_ref[...], h2, preferred_element_type=f32)    # (B*MW, H)


def _full_spec(shape):
    nd = len(shape)
    return pl.BlockSpec(shape, lambda i, _nd=nd: (0,) * _nd)


def _pack_params(p):
    """Layout plumbing in the wrapper: head-major QKV/O stacking + vector packing."""
    wq = p["wq"].reshape(H, NH, HD).transpose(1, 0, 2)     # (NH, H, HD)
    wk = p["wk"].reshape(H, NH, HD).transpose(1, 0, 2)
    wv = p["wv"].reshape(H, NH, HD).transpose(1, 0, 2)
    wqkv = jnp.concatenate([wq, wk, wv], axis=0)           # (3*NH, H, HD)
    bq = p["bq"].reshape(NH, 1, HD)
    bk = p["bk"].reshape(NH, 1, HD)
    bv = p["bv"].reshape(NH, 1, HD)
    bqkv = jnp.concatenate([bq, bk, bv], axis=0)           # (3*NH, 1, HD)
    wo = p["wo"].reshape(NH, HD, H)                        # (NH, HD, H)
    lnv = jnp.concatenate([p["emb_g"], p["emb_b"], p["bo"], p["g1"], p["be1"],
                           p["b2"], p["g2"], p["be2"]], axis=0)          # (8, H)
    tok_emb_pad = jnp.zeros((VOCAB_PAD, H), jnp.float32).at[:VOCAB].set(p["tok_emb"])
    return wqkv, bqkv, wo, lnv, tok_emb_pad


def context_encoder_forward(input_ids, attn_mask, output_mask, p):
    """ContextEncoder.forward.

    Returns:
      pooled:      (B, MW, H) word-level vectors, zero-padded; valid rows of
                   example b are pooled[b, :n_words_b].  Static-shape stand-in
                   for the ragged torch.cat(example_arr, dim=0).
      example_len: (B,) int32 cumulative (n_words - 1), as in the PyTorch code.
    """
    ids_col = input_ids.reshape(T, 1).astype(jnp.int32)

    # Additive attention bias, precomputed once: key padding + block-diagonal
    # "stay inside your own example" constraint.
    ex = jnp.arange(T, dtype=jnp.int32) // S
    key_ok = attn_mask.reshape(T) > 0
    keep = (ex[:, None] == ex[None, :]) & key_ok[None, :]
    bias2d = jnp.where(keep, 0.0, NEG_INF).astype(jnp.float32)           # (T, T)

    # Subword -> word average-pooling matrix (process_encoder_outputs as matmul).
    w_ids = jnp.arange(MW, dtype=output_mask.dtype)
    sel = (output_mask[:, None, :] == w_ids[None, :, None]).astype(jnp.float32)  # (B,MW,S)
    cnt = jnp.maximum(sel.sum(-1, keepdims=True), 1.0)
    pool = sel / cnt
    pool_flat = jnp.einsum("bws,bc->bwcs", pool,
                           jnp.eye(B, dtype=jnp.float32)).reshape(B * MW, T)

    n_words = jnp.sum(jnp.any(sel > 0, axis=-1), axis=-1)                # (B,)
    example_len = jnp.cumsum(n_words - 1).astype(jnp.int32)

    pos_flat = jnp.tile(p["pos_emb"], (B, 1))                            # (T, H)
    wqkv, bqkv, wo, lnv, tok_emb_pad = _pack_params(p)

    operands = [ids_col, bias2d, pool_flat,
                tok_emb_pad, pos_flat, lnv,
                wqkv, bqkv, wo,
                p["w1"], p["b1"], p["w2"]]

    pooled_flat = pl.pallas_call(
        _context_encoder_kernel,
        out_shape=jax.ShapeDtypeStruct((B * MW, H), jnp.float32),
        grid=(1,),                             # single step: whole batch in VMEM
        in_specs=[_full_spec(op.shape) for op in operands],
        out_specs=pl.BlockSpec((B * MW, H), lambda i: (0, 0)),
        compiler_params=pltpu.CompilerParams(dimension_semantics=("arbitrary",)),
    )(*operands)

    # TODO(synk): torch.cat over ragged per-example word counts has no
    # static-shape Pallas equivalent; we return the zero-padded (B, MW, H)
    # tensor plus example_len instead.
    return pooled_flat.reshape(B, MW, H), example_len


# --------------------------- pure-JAX reference -------------------------------
def ref_forward(input_ids, attn_mask, output_mask, p):
    x = p["tok_emb"][input_ids] + p["pos_emb"][None, :, :]
    x = _layernorm(x, p["emb_g"], p["emb_b"])
    q = x @ p["wq"] + p["bq"]
    k = x @ p["wk"] + p["bk"]
    v = x @ p["wv"] + p["bv"]
    qh = q.reshape(B, S, NH, HD).transpose(0, 2, 1, 3)
    kh = k.reshape(B, S, NH, HD).transpose(0, 2, 1, 3)
    vh = v.reshape(B, S, NH, HD).transpose(0, 2, 1, 3)
    bias = (attn_mask.astype(jnp.float32) - 1.0) * 1e9
    s = jnp.einsum("bhqd,bhkd->bhqk", qh, kh) / math.sqrt(HD) + bias[:, None, None, :]
    a = jax.nn.softmax(s, axis=-1)
    ctx = jnp.einsum("bhqk,bhkd->bhqd", a, vh).transpose(0, 2, 1, 3).reshape(B, S, H)
    attn_out = ctx @ p["wo"] + p["bo"]
    h1 = _layernorm(x + attn_out, p["g1"], p["be1"])
    ff = jax.nn.gelu(h1 @ p["w1"] + p["b1"], approximate=True)
    ff = ff @ p["w2"] + p["b2"]
    h2 = _layernorm(h1 + ff, p["g2"], p["be2"])                          # (B, S, H)

    # process_encoder_outputs: average subword tokens sharing a word index.
    w_ids = jnp.arange(MW, dtype=output_mask.dtype)
    sel = (output_mask[:, None, :] == w_ids[None, :, None]).astype(jnp.float32)
    cnt = jnp.maximum(sel.sum(-1, keepdims=True), 1.0)
    pooled = jnp.einsum("bws,bsh->bwh", sel / cnt, h2)
    n_words = jnp.sum(jnp.any(sel > 0, axis=-1), axis=-1)
    example_len = jnp.cumsum(n_words - 1).astype(jnp.int32)
    return pooled, example_len


# --------------------------- deterministic params -----------------------------
def make_params(key):
    ks = jax.random.split(key, 20)
    nrm = lambda k, shape: 0.02 * jax.random.normal(k, shape, jnp.float32)
    return {
        "tok_emb": nrm(ks[0], (VOCAB, H)),
        "pos_emb": nrm(ks[1], (S, H)),
        "emb_g": 1.0 + nrm(ks[2], (1, H)), "emb_b": nrm(ks[3], (1, H)),
        "wq": nrm(ks[4], (H, H)), "bq": nrm(ks[5], (1, H)),
        "wk": nrm(ks[6], (H, H)), "bk": nrm(ks[7], (1, H)),
        "wv": nrm(ks[8], (H, H)), "bv": nrm(ks[9], (1, H)),
        "wo": nrm(ks[10], (H, H)), "bo": nrm(ks[11], (1, H)),
        "g1": 1.0 + nrm(ks[12], (1, H)), "be1": nrm(ks[13], (1, H)),
        "w1": nrm(ks[14], (H, FFN)), "b1": nrm(ks[15], (1, FFN)),
        "w2": nrm(ks[16], (FFN, H)), "b2": nrm(ks[17], (1, H)),
        "g2": 1.0 + nrm(ks[18], (1, H)), "be2": nrm(ks[19], (1, H)),
    }


if __name__ == "__main__":
    key = jax.random.PRNGKey(0)
    pkey, ikey = jax.random.split(key)
    params = make_params(pkey)

    input_ids = jax.random.randint(ikey, (B, S), 0, VOCAB, dtype=jnp.int32)
    attn_mask = jnp.array([[1, 1, 1, 1, 1, 1, 1, 1],
                           [1, 1, 1, 1, 1, 1, 0, 0]], dtype=jnp.int32)
    # word index per subword token; -1 = [CLS]/[SEP]/padding
    output_mask = jnp.array([[-1, 0, 1, 1, 2, 3, 4, -1],
                             [-1, 0, 0, 1, 2, -1, -1, -1]], dtype=jnp.int32)

    fwd = jax.jit(context_encoder_forward)
    pooled, example_len = fwd(input_ids, attn_mask, output_mask, params)
    pooled = jax.block_until_ready(pooled)
    example_len = jax.block_until_ready(example_len)

    ref_pooled, ref_len = ref_forward(input_ids, attn_mask, output_mask, params)
    ref_pooled = jax.block_until_ready(ref_pooled)

    np.testing.assert_allclose(np.asarray(pooled), np.asarray(ref_pooled),
                               atol=2e-4, rtol=2e-4)
    np.testing.assert_array_equal(np.asarray(example_len), np.asarray(ref_len))
    assert pooled.shape == (B, MW, H)
    print("KERNEL_OK")
</pallas_src>

<mosaic_0001>
module attributes {stable_mosaic.version = 11 : i64} {
  func.func @_context_encoder_kernel(%arg0: i32, %arg1: memref<16x1xi32, #tpu.memory_space<vmem>>, %arg2: memref<16x16xf32, #tpu.memory_space<vmem>>, %arg3: memref<16x16xf32, #tpu.memory_space<vmem>>, %arg4: memref<128x32xf32, #tpu.memory_space<vmem>>, %arg5: memref<16x32xf32, #tpu.memory_space<vmem>>, %arg6: memref<8x32xf32, #tpu.memory_space<vmem>>, %arg7: memref<6x32x16xf32, #tpu.memory_space<vmem>>, %arg8: memref<6x1x16xf32, #tpu.memory_space<vmem>>, %arg9: memref<2x16x32xf32, #tpu.memory_space<vmem>>, %arg10: memref<32x64xf32, #tpu.memory_space<vmem>>, %arg11: memref<1x64xf32, #tpu.memory_space<vmem>>, %arg12: memref<64x32xf32, #tpu.memory_space<vmem>>, %arg13: memref<16x32xf32, #tpu.memory_space<vmem>>) attributes {dimension_semantics = [#tpu.dimension_semantics<arbitrary>], iteration_bounds = array<i64: 1>, scalar_prefetch = 0 : i64, scratch_operands = 0 : i64, tpu.core_type = #tpu.core_type<tc>, window_params = [{pipeline_mode = #tpu.pipeline_mode<synchronous>, transform_indices = @transform_0, window_bounds = array<i64: 16, 1>}, {pipeline_mode = #tpu.pipeline_mode<synchronous>, transform_indices = @transform_1, window_bounds = array<i64: 16, 16>}, {pipeline_mode = #tpu.pipeline_mode<synchronous>, transform_indices = @transform_2, window_bounds = array<i64: 16, 16>}, {pipeline_mode = #tpu.pipeline_mode<synchronous>, transform_indices = @transform_3, window_bounds = array<i64: 128, 32>}, {pipeline_mode = #tpu.pipeline_mode<synchronous>, transform_indices = @transform_4, window_bounds = array<i64: 16, 32>}, {pipeline_mode = #tpu.pipeline_mode<synchronous>, transform_indices = @transform_5, window_bounds = array<i64: 8, 32>}, {pipeline_mode = #tpu.pipeline_mode<synchronous>, transform_indices = @transform_6, window_bounds = array<i64: 6, 32, 16>}, {pipeline_mode = #tpu.pipeline_mode<synchronous>, transform_indices = @transform_7, window_bounds = array<i64: 6, 1, 16>}, {pipeline_mode = #tpu.pipeline_mode<synchronous>, transform_indices = @transform_8, window_bounds = array<i64: 2, 16, 32>}, {pipeline_mode = #tpu.pipeline_mode<synchronous>, transform_indices = @transform_9, window_bounds = array<i64: 32, 64>}, {pipeline_mode = #tpu.pipeline_mode<synchronous>, transform_indices = @transform_10, window_bounds = array<i64: 1, 64>}, {pipeline_mode = #tpu.pipeline_mode<synchronous>, transform_indices = @transform_11, window_bounds = array<i64: 64, 32>}, {pipeline_mode = #tpu.pipeline_mode<synchronous>, transform_indices = @transform_12, window_bounds = array<i64: 16, 32>}]} {
    %c0 = arith.constant 0 : index
    %c0_0 = arith.constant 0 : index
    %0 = vector.load %arg6[%c0, %c0_0] : memref<8x32xf32, #tpu.memory_space<vmem>>, vector<8x32xf32>
    %1 = vector.extract_strided_slice %0 {offsets = [0, 0], sizes = [1, 32], strides = [1, 1]} : vector<8x32xf32> to vector<1x32xf32>
    %2 = vector.extract_strided_slice %0 {offsets = [1, 0], sizes = [1, 32], strides = [1, 1]} : vector<8x32xf32> to vector<1x32xf32>
    %3 = vector.extract_strided_slice %0 {offsets = [2, 0], sizes = [1, 32], strides = [1, 1]} : vector<8x32xf32> to vector<1x32xf32>
    %4 = vector.extract_strided_slice %0 {offsets = [3, 0], sizes = [1, 32], strides = [1, 1]} : vector<8x32xf32> to vector<1x32xf32>
    %5 = vector.extract_strided_slice %0 {offsets = [4, 0], sizes = [1, 32], strides = [1, 1]} : vector<8x32xf32> to vector<1x32xf32>
    %6 = vector.extract_strided_slice %0 {offsets = [5, 0], sizes = [1, 32], strides = [1, 1]} : vector<8x32xf32> to vector<1x32xf32>
    %7 = vector.extract_strided_slice %0 {offsets = [6, 0], sizes = [1, 32], strides = [1, 1]} : vector<8x32xf32> to vector<1x32xf32>
    %8 = vector.extract_strided_slice %0 {offsets = [7, 0], sizes = [1, 32], strides = [1, 1]} : vector<8x32xf32> to vector<1x32xf32>
    %c0_1 = arith.constant 0 : index
    %c0_2 = arith.constant 0 : index
    %9 = vector.load %arg1[%c0_1, %c0_2] : memref<16x1xi32, #tpu.memory_space<vmem>>, vector<16x1xi32>
    %10 = tpu.iota {dimensions = array<i32: 1>} : vector<16x128xi32>
    %11 = vector.broadcast %9 : vector<16x1xi32> to vector<16x128xi32>
    %12 = arith.cmpi eq, %10, %11 : vector<16x128xi32>
    %13 = arith.extui %12 : vector<16x128xi1> to vector<16x128xi32>
    %14 = arith.sitofp %13 : vector<16x128xi32> to vector<16x128xf32>
    %c0_3 = arith.constant 0 : index
    %c0_4 = arith.constant 0 : index
    %15 = vector.load %arg4[%c0_3, %c0_4] : memref<128x32xf32, #tpu.memory_space<vmem>>, vector<128x32xf32>
    %cst = arith.constant dense<0.000000e+00> : vector<16x32xf32>
    %16 = tpu.matmul %14, %15, %cst {dimension_numbers = #tpu.dot_dimension_numbers<[1], [0], [0], [1], [0, 0, 1, 1], [], []>} : vector<16x128xf32>, vector<128x32xf32>, vector<16x32xf32> -> vector<16x32xf32>
    %c0_5 = arith.constant 0 : index
    %c0_6 = arith.constant 0 : index
    %17 = vector.load %arg5[%c0_5, %c0_6] : memref<16x32xf32, #tpu.memory_space<vmem>>, vector<16x32xf32>
    %18 = arith.addf %16, %17 : vector<16x32xf32>
    %cst_7 = arith.constant dense<0.000000e+00> : vector<16xf32>
    %19 = vector.multi_reduction <add>, %18, %cst_7 [1] : vector<16x32xf32> to vector<16xf32>
    %20 = vector.shape_cast %19 : vector<16xf32> to vector<16x1xf32>
    %cst_8 = arith.constant 3.200000e+01 : f32
    %21 = vector.broadcast %cst_8 : f32 to vector<16x1xf32>
    %22 = arith.divf %20, %21 : vector<16x1xf32>
    %23 = vector.broadcast %22 : vector<16x1xf32> to vector<16x32xf32>
    %24 = arith.subf %18, %23 : vector<16x32xf32>
    %25 = arith.mulf %24, %24 : vector<16x32xf32>
    %cst_9 = arith.constant dense<0.000000e+00> : vector<16xf32>
    %26 = vector.multi_reduction <add>, %25, %cst_9 [1] : vector<16x32xf32> to vector<16xf32>
    %27 = vector.shape_cast %26 : vector<16xf32> to vector<16x1xf32>
    %cst_10 = arith.constant 3.200000e+01 : f32
    %28 = vector.broadcast %cst_10 : f32 to vector<16x1xf32>
    %29 = arith.divf %27, %28 : vector<16x1xf32>
    %30 = vector.broadcast %22 : vector<16x1xf32> to vector<16x32xf32>
    %31 = arith.subf %18, %30 : vector<16x32xf32>
    %cst_11 = arith.constant 9.99999996E-13 : f32
    %32 = vector.broadcast %cst_11 : f32 to vector<16x1xf32>
    %33 = arith.addf %29, %32 : vector<16x1xf32>
    %34 = math.rsqrt %33 : vector<16x1xf32>
    %35 = vector.broadcast %34 : vector<16x1xf32> to vector<16x32xf32>
    %36 = arith.mulf %31, %35 : vector<16x32xf32>
    %37 = vector.broadcast %1 : vector<1x32xf32> to vector<16x32xf32>
    %38 = arith.mulf %36, %37 : vector<16x32xf32>
    %39 = vector.broadcast %2 : vector<1x32xf32> to vector<16x32xf32>
    %40 = arith.addf %38, %39 : vector<16x32xf32>
    %c0_12 = arith.constant 0 : index
    %c0_13 = arith.constant 0 : index
    %41 = vector.load %arg2[%c0_12, %c0_13] : memref<16x16xf32, #tpu.memory_space<vmem>>, vector<16x16xf32>
    %cst_14 = arith.constant 0.000000e+00 : f32
    %42 = vector.broadcast %cst_14 : f32 to vector<16x32xf32>
    %c0_15 = arith.constant 0 : index
    %c0_16 = arith.constant 0 : index
    %c0_17 = arith.constant 0 : index
    %43 = vector.load %arg7[%c0_15, %c0_16, %c0_17] : memref<6x32x16xf32, #tpu.memory_space<vmem>>, vector<1x32x16xf32>
    %44 = vector.shape_cast %43 : vector<1x32x16xf32> to vector<32x16xf32>
    %cst_18 = arith.constant dense<0.000000e+00> : vector<16x16xf32>
    %45 = tpu.matmul %40, %44, %cst_18 {dimension_numbers = #tpu.dot_dimension_numbers<[1], [0], [0], [1], [0, 0, 1, 1], [], []>} : vector<16x32xf32>, vector<32x16xf32>, vector<16x16xf32> -> vector<16x16xf32>
    %c0_19 = arith.constant 0 : index
    %c0_20 = arith.constant 0 : index
    %c0_21 = arith.constant 0 : index
    %46 = vector.load %arg8[%c0_19, %c0_20, %c0_21] : memref<6x1x16xf32, #tpu.memory_space<vmem>>, vector<1x1x16xf32>
    %47 = vector.shape_cast %46 : vector<1x1x16xf32> to vector<1x16xf32>
    %48 = vector.broadcast %47 : vector<1x16xf32> to vector<16x16xf32>
    %49 = arith.addf %45, %48 : vector<16x16xf32>
    %c2 = arith.constant 2 : index
    %c0_22 = arith.constant 0 : index
    %c0_23 = arith.constant 0 : index
    %50 = vector.load %arg7[%c2, %c0_22, %c0_23] : memref<6x32x16xf32, #tpu.memory_space<vmem>>, vector<1x32x16xf32>
    %51 = vector.shape_cast %50 : vector<1x32x16xf32> to vector<32x16xf32>
    %cst_24 = arith.constant dense<0.000000e+00> : vector<16x16xf32>
    %52 = tpu.matmul %40, %51, %cst_24 {dimension_numbers = #tpu.dot_dimension_numbers<[1], [0], [0], [1], [0, 0, 1, 1], [], []>} : vector<16x32xf32>, vector<32x16xf32>, vector<16x16xf32> -> vector<16x16xf32>
    %c2_25 = arith.constant 2 : index
    %c0_26 = arith.constant 0 : index
    %c0_27 = arith.constant 0 : index
    %53 = vector.load %arg8[%c2_25, %c0_26, %c0_27] : memref<6x1x16xf32, #tpu.memory_space<vmem>>, vector<1x1x16xf32>
    %54 = vector.shape_cast %53 : vector<1x1x16xf32> to vector<1x16xf32>
    %55 = vector.broadcast %54 : vector<1x16xf32> to vector<16x16xf32>
    %56 = arith.addf %52, %55 : vector<16x16xf32>
    %c4 = arith.constant 4 : index
    %c0_28 = arith.constant 0 : index
    %c0_29 = arith.constant 0 : index
    %57 = vector.load %arg7[%c4, %c0_28, %c0_29] : memref<6x32x16xf32, #tpu.memory_space<vmem>>, vector<1x32x16xf32>
    %58 = vector.shape_cast %57 : vector<1x32x16xf32> to vector<32x16xf32>
    %cst_30 = arith.constant dense<0.000000e+00> : vector<16x16xf32>
    %59 = tpu.matmul %40, %58, %cst_30 {dimension_numbers = #tpu.dot_dimension_numbers<[1], [0], [0], [1], [0, 0, 1, 1], [], []>} : vector<16x32xf32>, vector<32x16xf32>, vector<16x16xf32> -> vector<16x16xf32>
    %c4_31 = arith.constant 4 : index
    %c0_32 = arith.constant 0 : index
    %c0_33 = arith.constant 0 : index
    %60 = vector.load %arg8[%c4_31, %c0_32, %c0_33] : memref<6x1x16xf32, #tpu.memory_space<vmem>>, vector<1x1x16xf32>
    %61 = vector.shape_cast %60 : vector<1x1x16xf32> to vector<1x16xf32>
    %62 = vector.broadcast %61 : vector<1x16xf32> to vector<16x16xf32>
    %63 = arith.addf %59, %62 : vector<16x16xf32>
    %cst_34 = arith.constant dense<0.000000e+00> : vector<16x16xf32>
    %64 = tpu.matmul %49, %56, %cst_34 {dimension_numbers = #tpu.dot_dimension_numbers<[1], [1], [0], [0], [0, 0, 1, 0], [], []>} : vector<16x16xf32>, vector<16x16xf32>, vector<16x16xf32> -> vector<16x16xf32>
    %cst_35 = arith.constant 2.500000e-01 : f32
    %65 = vector.broadcast %cst_35 : f32 to vector<16x16xf32>
    %66 = arith.mulf %64, %65 : vector<16x16xf32>
    %67 = arith.addf %66, %41 : vector<16x16xf32>
    %cst_36 = arith.constant dense<0xFF800000> : vector<16xf32>
    %68 = vector.multi_reduction <maximumf>, %67, %cst_36 [1] : vector<16x16xf32> to vector<16xf32>
    %69 = vector.shape_cast %68 : vector<16xf32> to vector<16x1xf32>
    %70 = vector.broadcast %69 : vector<16x1xf32> to vector<16x16xf32>
    %71 = arith.subf %67, %70 : vector<16x16xf32>
    %72 = math.exp %71 : vector<16x16xf32>
    %cst_37 = arith.constant dense<0.000000e+00> : vector<16xf32>
    %73 = vector.multi_reduction <add>, %72, %cst_37 [1] : vector<16x16xf32> to vector<16xf32>
    %74 = vector.shape_cast %73 : vector<16xf32> to vector<16x1xf32>
    %75 = tpu.reciprocal %74 : vector<16x1xf32> -> vector<16x1xf32>
    %76 = vector.broadcast %75 : vector<16x1xf32> to vector<16x16xf32>
    %77 = arith.mulf %72, %76 : vector<16x16xf32>
    %cst_38 = arith.constant dense<0.000000e+00> : vector<16x16xf32>
    %78 = tpu.matmul %77, %63, %cst_38 {dimension_numbers = #tpu.dot_dimension_numbers<[1], [0], [0], [1], [0, 0, 1, 1], [], []>} : vector<16x16xf32>, vector<16x16xf32>, vector<16x16xf32> -> vector<16x16xf32>
    %c0_39 = arith.constant 0 : index
    %c0_40 = arith.constant 0 : index
    %c0_41 = arith.constant 0 : index
    %79 = vector.load %arg9[%c0_39, %c0_40, %c0_41] : memref<2x16x32xf32, #tpu.memory_space<vmem>>, vector<1x16x32xf32>
    %80 = vector.shape_cast %79 : vector<1x16x32xf32> to vector<16x32xf32>
    %cst_42 = arith.constant dense<0.000000e+00> : vector<16x32xf32>
    %81 = tpu.matmul %78, %80, %cst_42 {dimension_numbers = #tpu.dot_dimension_numbers<[1], [0], [0], [1], [0, 0, 1, 1], [], []>} : vector<16x16xf32>, vector<16x32xf32>, vector<16x32xf32> -> vector<16x32xf32>
    %82 = arith.addf %42, %81 : vector<16x32xf32>
    %c1 = arith.constant 1 : index
    %c0_43 = arith.constant 0 : index
    %c0_44 = arith.constant 0 : index
    %83 = vector.load %arg7[%c1, %c0_43, %c0_44] : memref<6x32x16xf32, #tpu.memory_space<vmem>>, vector<1x32x16xf32>
    %84 = vector.shape_cast %83 : vector<1x32x16xf32> to vector<32x16xf32>
    %cst_45 = arith.constant dense<0.000000e+00> : vector<16x16xf32>
    %85 = tpu.matmul %40, %84, %cst_45 {dimension_numbers = #tpu.dot_dimension_numbers<[1], [0], [0], [1], [0, 0, 1, 1], [], []>} : vector<16x32xf32>, vector<32x16xf32>, vector<16x16xf32> -> vector<16x16xf32>
    %c1_46 = arith.constant 1 : index
    %c0_47 = arith.constant 0 : index
    %c0_48 = arith.constant 0 : index
    %86 = vector.load %arg8[%c1_46, %c0_47, %c0_48] : memref<6x1x16xf32, #tpu.memory_space<vmem>>, vector<1x1x16xf32>
    %87 = vector.shape_cast %86 : vector<1x1x16xf32> to vector<1x16xf32>
    %88 = vector.broadcast %87 : vector<1x16xf32> to vector<16x16xf32>
    %89 = arith.addf %85, %88 : vector<16x16xf32>
    %c3 = arith.constant 3 : index
    %c0_49 = arith.constant 0 : index
    %c0_50 = arith.constant 0 : index
    %90 = vector.load %arg7[%c3, %c0_49, %c0_50] : memref<6x32x16xf32, #tpu.memory_space<vmem>>, vector<1x32x16xf32>
    %91 = vector.shape_cast %90 : vector<1x32x16xf32> to vector<32x16xf32>
    %cst_51 = arith.constant dense<0.000000e+00> : vector<16x16xf32>
    %92 = tpu.matmul %40, %91, %cst_51 {dimension_numbers = #tpu.dot_dimension_numbers<[1], [0], [0], [1], [0, 0, 1, 1], [], []>} : vector<16x32xf32>, vector<32x16xf32>, vector<16x16xf32> -> vector<16x16xf32>
    %c3_52 = arith.constant 3 : index
    %c0_53 = arith.constant 0 : index
    %c0_54 = arith.constant 0 : index
    %93 = vector.load %arg8[%c3_52, %c0_53, %c0_54] : memref<6x1x16xf32, #tpu.memory_space<vmem>>, vector<1x1x16xf32>
    %94 = vector.shape_cast %93 : vector<1x1x16xf32> to vector<1x16xf32>
    %95 = vector.broadcast %94 : vector<1x16xf32> to vector<16x16xf32>
    %96 = arith.addf %92, %95 : vector<16x16xf32>
    %c5 = arith.constant 5 : index
    %c0_55 = arith.constant 0 : index
    %c0_56 = arith.constant 0 : index
    %97 = vector.load %arg7[%c5, %c0_55, %c0_56] : memref<6x32x16xf32, #tpu.memory_space<vmem>>, vector<1x32x16xf32>
    %98 = vector.shape_cast %97 : vector<1x32x16xf32> to vector<32x16xf32>
    %cst_57 = arith.constant dense<0.000000e+00> : vector<16x16xf32>
    %99 = tpu.matmul %40, %98, %cst_57 {dimension_numbers = #tpu.dot_dimension_numbers<[1], [0], [0], [1], [0, 0, 1, 1], [], []>} : vector<16x32xf32>, vector<32x16xf32>, vector<16x16xf32> -> vector<16x16xf32>
    %c5_58 = arith.constant 5 : index
    %c0_59 = arith.constant 0 : index
    %c0_60 = arith.constant 0 : index
    %100 = vector.load %arg8[%c5_58, %c0_59, %c0_60] : memref<6x1x16xf32, #tpu.memory_space<vmem>>, vector<1x1x16xf32>
    %101 = vector.shape_cast %100 : vector<1x1x16xf32> to vector<1x16xf32>
    %102 = vector.broadcast %101 : vector<1x16xf32> to vector<16x16xf32>
    %103 = arith.addf %99, %102 : vector<16x16xf32>
    %cst_61 = arith.constant dense<0.000000e+00> : vector<16x16xf32>
    %104 = tpu.matmul %89, %96, %cst_61 {dimension_numbers = #tpu.dot_dimension_numbers<[1], [1], [0], [0], [0, 0, 1, 0], [], []>} : vector<16x16xf32>, vector<16x16xf32>, vector<16x16xf32> -> vector<16x16xf32>
    %cst_62 = arith.constant 2.500000e-01 : f32
    %105 = vector.broadcast %cst_62 : f32 to vector<16x16xf32>
    %106 = arith.mulf %104, %105 : vector<16x16xf32>
    %107 = arith.addf %106, %41 : vector<16x16xf32>
    %cst_63 = arith.constant dense<0xFF800000> : vector<16xf32>
    %108 = vector.multi_reduction <maximumf>, %107, %cst_63 [1] : vector<16x16xf32> to vector<16xf32>
    %109 = vector.shape_cast %108 : vector<16xf32> to vector<16x1xf32>
    %110 = vector.broadcast %109 : vector<16x1xf32> to vector<16x16xf32>
    %111 = arith.subf %107, %110 : vector<16x16xf32>
    %112 = math.exp %111 : vector<16x16xf32>
    %cst_64 = arith.constant dense<0.000000e+00> : vector<16xf32>
    %113 = vector.multi_reduction <add>, %112, %cst_64 [1] : vector<16x16xf32> to vector<16xf32>
    %114 = vector.shape_cast %113 : vector<16xf32> to vector<16x1xf32>
    %115 = tpu.reciprocal %114 : vector<16x1xf32> -> vector<16x1xf32>
    %116 = vector.broadcast %115 : vector<16x1xf32> to vector<16x16xf32>
    %117 = arith.mulf %112, %116 : vector<16x16xf32>
    %cst_65 = arith.constant dense<0.000000e+00> : vector<16x16xf32>
    %118 = tpu.matmul %117, %103, %cst_65 {dimension_numbers = #tpu.dot_dimension_numbers<[1], [0], [0], [1], [0, 0, 1, 1], [], []>} : vector<16x16xf32>, vector<16x16xf32>, vector<16x16xf32> -> vector<16x16xf32>
    %c1_66 = arith.constant 1 : index
    %c0_67 = arith.constant 0 : index
    %c0_68 = arith.constant 0 : index
    %119 = vector.load %arg9[%c1_66, %c0_67, %c0_68] : memref<2x16x32xf32, #tpu.memory_space<vmem>>, vector<1x16x32xf32>
    %120 = vector.shape_cast %119 : vector<1x16x32xf32> to vector<16x32xf32>
    %cst_69 = arith.constant dense<0.000000e+00> : vector<16x32xf32>
    %121 = tpu.matmul %118, %120, %cst_69 {dimension_numbers = #tpu.dot_dimension_numbers<[1], [0], [0], [1], [0, 0, 1, 1], [], []>} : vector<16x16xf32>, vector<16x32xf32>, vector<16x32xf32> -> vector<16x32xf32>
    %122 = arith.addf %82, %121 : vector<16x32xf32>
    %123 = arith.addf %40, %122 : vector<16x32xf32>
    %124 = vector.broadcast %3 : vector<1x32xf32> to vector<16x32xf32>
    %125 = arith.addf %123, %124 : vector<16x32xf32>
    %cst_70 = arith.constant dense<0.000000e+00> : vector<16xf32>
    %126 = vector.multi_reduction <add>, %125, %cst_70 [1] : vector<16x32xf32> to vector<16xf32>
    %127 = vector.shape_cast %126 : vector<16xf32> to vector<16x1xf32>
    %cst_71 = arith.constant 3.200000e+01 : f32
    %128 = vector.broadcast %cst_71 : f32 to vector<16x1xf32>
    %129 = arith.divf %127, %128 : vector<16x1xf32>
    %130 = vector.broadcast %129 : vector<16x1xf32> to vector<16x32xf32>
    %131 = arith.subf %125, %130 : vector<16x32xf32>
    %132 = arith.mulf %131, %131 : vector<16x32xf32>
    %cst_72 = arith.constant dense<0.000000e+00> : vector<16xf32>
    %133 = vector.multi_reduction <add>, %132, %cst_72 [1] : vector<16x32xf32> to vector<16xf32>
    %134 = vector.shape_cast %133 : vector<16xf32> to vector<16x1xf32>
    %cst_73 = arith.constant 3.200000e+01 : f32
    %135 = vector.broadcast %cst_73 : f32 to vector<16x1xf32>
    %136 = arith.divf %134, %135 : vector<16x1xf32>
    %137 = vector.broadcast %129 : vector<16x1xf32> to vector<16x32xf32>
    %138 = arith.subf %125, %137 : vector<16x32xf32>
    %cst_74 = arith.constant 9.99999996E-13 : f32
    %139 = vector.broadcast %cst_74 : f32 to vector<16x1xf32>
    %140 = arith.addf %136, %139 : vector<16x1xf32>
    %141 = math.rsqrt %140 : vector<16x1xf32>
    %142 = vector.broadcast %141 : vector<16x1xf32> to vector<16x32xf32>
    %143 = arith.mulf %138, %142 : vector<16x32xf32>
    %144 = vector.broadcast %4 : vector<1x32xf32> to vector<16x32xf32>
    %145 = arith.mulf %143, %144 : vector<16x32xf32>
    %146 = vector.broadcast %5 : vector<1x32xf32> to vector<16x32xf32>
    %147 = arith.addf %145, %146 : vector<16x32xf32>
    %c0_75 = arith.constant 0 : index
    %c0_76 = arith.constant 0 : index
    %148 = vector.load %arg10[%c0_75, %c0_76] : memref<32x64xf32, #tpu.memory_space<vmem>>, vector<32x64xf32>
    %cst_77 = arith.constant dense<0.000000e+00> : vector<16x64xf32>
    %149 = tpu.matmul %147, %148, %cst_77 {dimension_numbers = #tpu.dot_dimension_numbers<[1], [0], [0], [1], [0, 0, 1, 1], [], []>} : vector<16x32xf32>, vector<32x64xf32>, vector<16x64xf32> -> vector<16x64xf32>
    %c0_78 = arith.constant 0 : index
    %c0_79 = arith.constant 0 : index
    %150 = vector.load %arg11[%c0_78, %c0_79] : memref<1x64xf32, #tpu.memory_space<vmem>>, vector<1x64xf32>
    %151 = vector.broadcast %150 : vector<1x64xf32> to vector<16x64xf32>
    %152 = arith.addf %149, %151 : vector<16x64xf32>
    %153 = arith.mulf %152, %152 : vector<16x64xf32>
    %154 = arith.mulf %152, %153 : vector<16x64xf32>
    %cst_80 = arith.constant 4.471500e-02 : f32
    %155 = vector.broadcast %cst_80 : f32 to vector<16x64xf32>
    %156 = arith.mulf %155, %154 : vector<16x64xf32>
    %157 = arith.addf %152, %156 : vector<16x64xf32>
    %cst_81 = arith.constant 0.797884583 : f32
    %158 = vector.broadcast %cst_81 : f32 to vector<16x64xf32>
    %159 = arith.mulf %158, %157 : vector<16x64xf32>
    %160 = math.tanh %159 : vector<16x64xf32>
    %cst_82 = arith.constant 1.000000e+00 : f32
    %161 = vector.broadcast %cst_82 : f32 to vector<16x64xf32>
    %162 = arith.addf %161, %160 : vector<16x64xf32>
    %cst_83 = arith.constant 5.000000e-01 : f32
    %163 = vector.broadcast %cst_83 : f32 to vector<16x64xf32>
    %164 = arith.mulf %163, %162 : vector<16x64xf32>
    %165 = arith.mulf %152, %164 : vector<16x64xf32>
    %c0_84 = arith.constant 0 : index
    %c0_85 = arith.constant 0 : index
    %166 = vector.load %arg12[%c0_84, %c0_85] : memref<64x32xf32, #tpu.memory_space<vmem>>, vector<64x32xf32>
    %cst_86 = arith.constant dense<0.000000e+00> : vector<16x32xf32>
    %167 = tpu.matmul %165, %166, %cst_86 {dimension_numbers = #tpu.dot_dimension_numbers<[1], [0], [0], [1], [0, 0, 1, 1], [], []>} : vector<16x64xf32>, vector<64x32xf32>, vector<16x32xf32> -> vector<16x32xf32>
    %168 = vector.broadcast %6 : vector<1x32xf32> to vector<16x32xf32>
    %169 = arith.addf %167, %168 : vector<16x32xf32>
    %170 = arith.addf %147, %169 : vector<16x32xf32>
    %cst_87 = arith.constant dense<0.000000e+00> : vector<16xf32>
    %171 = vector.multi_reduction <add>, %170, %cst_87 [1] : vector<16x32xf32> to vector<16xf32>
    %172 = vector.shape_cast %171 : vector<16xf32> to vector<16x1xf32>
    %cst_88 = arith.constant 3.200000e+01 : f32
    %173 = vector.broadcast %cst_88 : f32 to vector<16x1xf32>
    %174 = arith.divf %172, %173 : vector<16x1xf32>
    %175 = vector.broadcast %174 : vector<16x1xf32> to vector<16x32xf32>
    %176 = arith.subf %170, %175 : vector<16x32xf32>
    %177 = arith.mulf %176, %176 : vector<16x32xf32>
    %cst_89 = arith.constant dense<0.000000e+00> : vector<16xf32>
    %178 = vector.multi_reduction <add>, %177, %cst_89 [1] : vector<16x32xf32> to vector<16xf32>
    %179 = vector.shape_cast %178 : vector<16xf32> to vector<16x1xf32>
    %cst_90 = arith.constant 3.200000e+01 : f32
    %180 = vector.broadcast %cst_90 : f32 to vector<16x1xf32>
    %181 = arith.divf %179, %180 : vector<16x1xf32>
    %182 = vector.broadcast %174 : vector<16x1xf32> to vector<16x32xf32>
    %183 = arith.subf %170, %182 : vector<16x32xf32>
    %cst_91 = arith.constant 9.99999996E-13 : f32
    %184 = vector.broadcast %cst_91 : f32 to vector<16x1xf32>
    %185 = arith.addf %181, %184 : vector<16x1xf32>
    %186 = math.rsqrt %185 : vector<16x1xf32>
    %187 = vector.broadcast %186 : vector<16x1xf32> to vector<16x32xf32>
    %188 = arith.mulf %183, %187 : vector<16x32xf32>
    %189 = vector.broadcast %7 : vector<1x32xf32> to vector<16x32xf32>
    %190 = arith.mulf %188, %189 : vector<16x32xf32>
    %191 = vector.broadcast %8 : vector<1x32xf32> to vector<16x32xf32>
    %192 = arith.addf %190, %191 : vector<16x32xf32>
    %c0_92 = arith.constant 0 : index
    %c0_93 = arith.constant 0 : index
    %193 = vector.load %arg3[%c0_92, %c0_93] : memref<16x16xf32, #tpu.memory_space<vmem>>, vector<16x16xf32>
    %cst_94 = arith.constant dense<0.000000e+00> : vector<16x32xf32>
    %194 = tpu.matmul %193, %192, %cst_94 {dimension_numbers = #tpu.dot_dimension_numbers<[1], [0], [0], [1], [0, 0, 1, 1], [], []>} : vector<16x16xf32>, vector<16x32xf32>, vector<16x32xf32> -> vector<16x32xf32>
    %c0_95 = arith.constant 0 : index
    %c0_96 = arith.constant 0 : index
    %195 = vector.load %arg13[%c0_95, %c0_96] : memref<16x32xf32, #tpu.memory_space<vmem>>, vector<16x32xf32>
    tpu.vector_store %arg13[%c0_95, %c0_96], %194 {strides = array<i32>} : memref<16x32xf32, #tpu.memory_space<vmem>>, vector<16x32xf32>,
    return
  }
  func.func @transform_0(%arg0: i32) -> (i32, i32) {
    %c0_i32 = arith.constant 0 : i32
    %c0_i32_0 = arith.constant 0 : i32
    %c0_i32_1 = arith.constant 0 : i32
    return %c0_i32, %c0_i32_0 : i32, i32
  }
  func.func @transform_1(%arg0: i32) -> (i32, i32) {
    %c0_i32 = arith.constant 0 : i32
    %c0_i32_0 = arith.constant 0 : i32
    %c0_i32_1 = arith.constant 0 : i32
    return %c0_i32, %c0_i32_0 : i32, i32
  }
  func.func @transform_2(%arg0: i32) -> (i32, i32) {
    %c0_i32 = arith.constant 0 : i32
    %c0_i32_0 = arith.constant 0 : i32
    %c0_i32_1 = arith.constant 0 : i32
    return %c0_i32, %c0_i32_0 : i32, i32
  }
  func.func @transform_3(%arg0: i32) -> (i32, i32) {
    %c0_i32 = arith.constant 0 : i32
    %c0_i32_0 = arith.constant 0 : i32
    %c0_i32_1 = arith.constant 0 : i32
    return %c0_i32, %c0_i32_0 : i32, i32
  }
  func.func @transform_4(%arg0: i32) -> (i32, i32) {
    %c0_i32 = arith.constant 0 : i32
    %c0_i32_0 = arith.constant 0 : i32
    %c0_i32_1 = arith.constant 0 : i32
    return %c0_i32, %c0_i32_0 : i32, i32
  }
  func.func @transform_5(%arg0: i32) -> (i32, i32) {
    %c0_i32 = arith.constant 0 : i32
    %c0_i32_0 = arith.constant 0 : i32
    %c0_i32_1 = arith.constant 0 : i32
    return %c0_i32, %c0_i32_0 : i32, i32
  }
  func.func @transform_6(%arg0: i32) -> (i32, i32, i32) {
    %c0_i32 = arith.constant 0 : i32
    %c0_i32_0 = arith.constant 0 : i32
    %c0_i32_1 = arith.constant 0 : i32
    %c0_i32_2 = arith.constant 0 : i32
    return %c0_i32, %c0_i32_0, %c0_i32_1 : i32, i32, i32
  }
  func.func @transform_7(%arg0: i32) -> (i32, i32, i32) {
    %c0_i32 = arith.constant 0 : i32
    %c0_i32_0 = arith.constant 0 : i32
    %c0_i32_1 = arith.constant 0 : i32
    %c0_i32_2 = arith.constant 0 : i32
    return %c0_i32, %c0_i32_0, %c0_i32_1 : i32, i32, i32
  }
  func.func @transform_8(%arg0: i32) -> (i32, i32, i32) {
    %c0_i32 = arith.constant 0 : i32
    %c0_i32_0 = arith.constant 0 : i32
    %c0_i32_1 = arith.constant 0 : i32
    %c0_i32_2 = arith.constant 0 : i32
    return %c0_i32, %c0_i32_0, %c0_i32_1 : i32, i32, i32
  }
  func.func @transform_9(%arg0: i32) -> (i32, i32) {
    %c0_i32 = arith.constant 0 : i32
    %c0_i32_0 = arith.constant 0 : i32
    %c0_i32_1 = arith.constant 0 : i32
    return %c0_i32, %c0_i32_0 : i32, i32
  }
  func.func @transform_10(%arg0: i32) -> (i32, i32) {
    %c0_i32 = arith.constant 0 : i32
    %c0_i32_0 = arith.constant 0 : i32
    %c0_i32_1 = arith.constant 0 : i32
    return %c0_i32, %c0_i32_0 : i32, i32
  }
  func.func @transform_11(%arg0: i32) -> (i32, i32) {
    %c0_i32 = arith.constant 0 : i32
    %c0_i32_0 = arith.constant 0 : i32
    %c0_i32_1 = arith.constant 0 : i32
    return %c0_i32, %c0_i32_0 : i32, i32
  }
  func.func @transform_12(%arg0: i32) -> (i32, i32) {
    %c0_i32 = arith.constant 0 : i32
    %c0_i32_0 = arith.constant 0 : i32
    %c0_i32_1 = arith.constant 0 : i32
    return %c0_i32, %c0_i32_0 : i32, i32
  }
}

</mosaic_0001>

<bundles_post_ra>
// kernel: context_encoder_forward.1
= control target key start
LH: loop header
LB: loop body
LE: loop exit
PB: predicated region body
PF: predicated region fallthrough
CT: control target
= control target key end

     0   :  { %v2223_v2 = vmov 0   ;;  %s2625_s0 = inlined_call_operand.vmem [shape: s32[16,1], index: 0, kind: input, shape index: {}]   ;;  %s2626_s1 = inlined_call_operand.vmem [shape: f32[16,16], index: 1, kind: input, shape index: {}]   ;;  %s2627_s2 = inlined_call_operand.vmem [shape: f32[16,16], index: 2, kind: input, shape index: {}]   ;;  %s2628_s3 = inlined_call_operand.vmem [shape: f32[128,32], index: 3, kind: input, shape index: {}]   ;;  %s2629_s4 = inlined_call_operand.vmem [shape: f32[16,32], index: 4, kind: input, shape index: {}]   ;;  %s2630_s5 = inlined_call_operand.vmem [shape: f32[8,32], index: 5, kind: input, shape index: {}]   ;;  %s2631_s6 = inlined_call_operand.vmem [shape: f32[6,32,16], index: 6, kind: input, shape index: {}]   ;;  %s2632_s7 = inlined_call_operand.vmem [shape: f32[6,1,16], index: 7, kind: input, shape index: {}]   ;;  %s2633_s8 = inlined_call_operand.vmem [shape: f32[2,16,32], index: 8, kind: input, shape index: {}]   ;;  %s2634_s9 = inlined_call_operand.vmem [shape: f32[32,64], index: 9, kind: input, shape index: {}]   ;;  %s2635_s10 = inlined_call_operand.vmem [shape: f32[1,64], index: 10, kind: input, shape index: {}]   ;;  %s2636_s11 = inlined_call_operand.vmem [shape: f32[64,32], index: 11, kind: input, shape index: {}]   ;;  %s2637_s12 = inlined_call_operand.hbm [shape: f32[16,32], index: 12, kind: output, shape index: {}]  }
   0x1   :  { %v43_v0 = vld [vmem:[%s2625_s0] sm:$0xff]  ;;  %2166 = vset.pattern.permute.xlu0 %v2223_v2  ;;  %v60_v3 = vld [vmem:[%s2628_s3 + $0x8] sm:$0xff]  ;;  %v61_v4 = vld [vmem:[%s2628_s3 + $0x10] sm:$0xff] }
   0x2   :  { %v59_v1 = vld [vmem:[%s2628_s3] sm:$0xff]  ;;  %v62_v5 = vld [vmem:[%s2628_s3 + $0x18] sm:$0xff]  ;;  %48 = vperm.xlu0 %2166, %v43_v0   ;;  %v44_v8 = vld [vmem:[%s2625_s0 + $0x8] sm:$0xff] }
   0x3   :  { %v2023_v6 = vpack.c.bf16 %v60_v3, %v59_v1  ;;  %v2027_v7 = vpack.c.bf16 %v62_v5, %v61_v4  ;;  %v63_v9 = vld [vmem:[%s2628_s3 + $0x20] sm:$0xff]  ;;  %v64_v10 = vld [vmem:[%s2628_s3 + $0x28] sm:$0xff] }
   0x4   :  { %v2031_v11 = vpack.c.bf16 %v64_v10, %v63_v9 }
   0x5   :  { %2024 = vmatprep.subr.bf16.mxu0 %v2023_v6 }
   0x6   :  { %2026 = vmatpush3.bf16.msra.mxu0 %v2023_v6  ;;  %51 = vperm.xlu0 %2166, %v44_v8  }
   0x7   :  { %2028 = vmatprep.subr.bf16.mxu0 %v2027_v7 }
   0x8   :  { %17 = vsyncpa [#allocation3], 0  ;;  %v65_v12 = vld [vmem:[%s2628_s3 + $0x30] sm:$0xff]  ;;  %v66_v13 = vld [vmem:[%s2628_s3 + $0x38] sm:$0xff]  ;;  %v45_v27 = vlaneseq  ;;  %v2224_v30 = vmov 1.0   ;;  %vm152_vm2 = vcmask 261120  }
   0x9   :  { %v2035_v14 = vpack.c.bf16 %v66_v13, %v65_v12  ;;  %v67_v15 = vld [vmem:[%s2628_s3 + $0x40] sm:$0xff]  ;;  %v68_v16 = vld [vmem:[%s2628_s3 + $0x48] sm:$0xff]  ;;  %v69_v18 = vld [vmem:[%s2628_s3 + $0x50] sm:$0xff]  ;;  %vm462_vm3 = vcmask 130048   ;;  %vm1450_vm5 = vcmask 523264   ;;  %s2225_s25 = smov [#allocation2]  }
   0xa   :  { %2030 = vmatpush3.bf16.msra.mxu0 %v2027_v7  ;;  %v2039_v17 = vpack.c.bf16 %v68_v16, %v67_v15  ;;  %v70_v19 = vld [vmem:[%s2628_s3 + $0x58] sm:$0xff]  ;;  %v71_v21 = vld [vmem:[%s2628_s3 + $0x60] sm:$0xff]  ;;  %v72_v22 = vld [vmem:[%s2628_s3 + $0x68] sm:$0xff]  ;;  %v46_v28 = vand.u32 127, %v45_v27  ;;  %v2387_v6 = vshrl.u32 %v45_v27, 7  ;;  %s1662_s26 = sshll.u32 %s2225_s25, 4  ;;  %s1663_s26 = int_to_ptr.vmem [resolvable:$true] %s1662_s26 }
   0xb   :  { %2032 = vmatprep.subr.bf16.mxu0 %v2031_v11  ;;  %v2043_v20 = vpack.c.bf16 %v70_v19, %v69_v18  ;;  %v2047_v23 = vpack.c.bf16 %v72_v22, %v71_v21  ;;  %v73_v24 = vld [vmem:[%s2628_s3 + $0x70] sm:$0xff]  ;;  %v74_v25 = vld [vmem:[%s2628_s3 + $0x78] sm:$0xff]  ;;  %v75_v32 = vld [vmem:[%s2629_s4] sm:$0xff]  ;;  %s2199_s27 = scalar_lea.vmem %s1663_s26, 256  ;;  %p2204_p1 = scmp.lt.s32.totalorder %s1663_s26, %s1663_s26 }
   0xc   :  { %v2051_v26 = vpack.c.bf16 %v74_v25, %v73_v24  ;;  %v76_v34 = vld [vmem:[%s2629_s4 + $0x8] sm:$0xff]  ;;  %v194_v50 = vld [vmem:[%s2631_s6] sm:$0xff]  ;;  %v196_v56 = vld [vmem:[%s2631_s6 + $0x10] sm:$0xff]  ;;  %v182_v8 = vsub.s32 0, %v2387_v6  ;;  %v188_v10 = vsub.s32 1, %v2387_v6  ;;  %p2200_p0 = scmp.ne.s32.totalorder %s1663_s26, %s2199_s27  ;;  %p2205_p2 = scmp.lt.s32.totalorder %s2199_s27, %s2199_s27 }
   0xd   :  { %v195_v51 = vld [vmem:[%s2631_s6 + $0x8] sm:$0xff]  ;;  %v1710_v53 = vld [vmem:[%s2631_s6 + $0x60] sm:$0xff]  ;;  %v197_v57 = vld [vmem:[%s2631_s6 + $0x18] sm:$0xff] }
   0xe   :  { %2034 = vmatpush3.bf16.msra.mxu0 %v2031_v11  ;;  %v2055_v52 = vpack.c.bf16 %v195_v51, %v194_v50  ;;  %v1711_v54 = vld [vmem:[%s2631_s6 + $0x68] sm:$0xff]  ;;  %v2059_v58 = vpack.c.bf16 %v197_v57, %v196_v56  ;;  %v1712_v59 = vld [vmem:[%s2631_s6 + $0x70] sm:$0xff]  ;;  %v1713_v60 = vld [vmem:[%s2631_s6 + $0x78] sm:$0xff]  ;;  %p2206_p3 = por %p2205_p2, %p2204_p1 }
   0xf   :  { %2036 = vmatprep.subr.bf16.mxu0 %v2035_v14  ;;  %v2097_v55 = vpack.c.bf16 %v1711_v54, %v1710_v53  ;;  %v2101_v61 = vpack.c.bf16 %v1713_v60, %v1712_v59  ;;  %v1680_v62 = vld [vmem:[%s2631_s6 + $0x40] sm:$0xff]  ;;  %v1681_v63 = vld [vmem:[%s2631_s6 + $0x48] sm:$0xff]  ;;  %v1682_v19 = vld [vmem:[%s2631_s6 + $0x50] sm:$0xff] }
  0x10   :  { %2056 = vmatprep.subr.bf16.mxu1 %v2055_v52  ;;  %v2063_v0 = vpack.c.bf16 %v1681_v63, %v1680_v62  ;;  %v2393_v9 = vld [vmem:[%s2630_s5] sm:$0xff]  ;;  %v1689_v25 = vld [vmem:[%s2631_s6 + $0x88] sm:$0xff]  ;;  %v1690_v27 = vld [vmem:[%s2631_s6 + $0x90] sm:$0xff]  ;;  %p2207_p4 = pnand %p2206_p3, %p2200_p0 }
  0x11   :  { %2058 = vmatpush3.bf16.msra.mxu1 %v2055_v52  ;;  %v183_v11 = vrot.slane %v2393_v9, %v182_v8  ;;  %v1688_v24 = vld [vmem:[%s2631_s6 + $0x80] sm:$0xff]  ;;  %vm2080_vm4 = vmpackc.low %vm462_vm3, %vm462_vm3 }
  0x12   :  { %2038 = vmatpush3.bf16.msra.mxu0 %v2035_v14  ;;  %2060 = vmatprep.subr.bf16.mxu1 %v2059_v58  ;;  %v189_v14 = vrot.slane %v2393_v9, %v188_v10 }
  0x13   :  { %2040 = vmatprep.subr.bf16.mxu0 %v2039_v17 }
  0x15   :  { %2062 = vmatpush3.bf16.msra.mxu1 %v2059_v58  ;;  %v2460_v58 = vld [vmem:[%s2626_s1 + $0x8] sm:$0xff] }
  0x16   :  { %2042 = vmatpush3.bf16.msra.mxu0 %v2039_v17  ;;  %2064 = vmatprep.subr.bf16.mxu1 %v2063_v0 }
  0x17   :  { %2044 = vmatprep.subr.bf16.mxu0 %v2043_v20 }
  0x1a   :  { %2046 = vmatpush3.bf16.msra.mxu0 %v2043_v20  ;;  %v1683_v20 = vld [vmem:[%s2631_s6 + $0x58] sm:$0xff] }
  0x1b   :  { %2048 = vmatprep.subr.bf16.mxu0 %v2047_v23 }
  0x1e   :  { %2050 = vmatpush3.bf16.msra.mxu0 %v2047_v23  ;;  %v2067_v23 = vpack.c.bf16 %v1683_v20, %v1682_v19  ;;  %v1704_v19 = vld [vmem:[%s2631_s6 + $0x30] sm:$0xff]  ;;  %v1705_v20 = vld [vmem:[%s2631_s6 + $0x38] sm:$0xff] }
  0x1f   :  { %2052 = vmatprep.subr.bf16.mxu0 %v2051_v26 }
  0x22   :  { %2054 = vmatpush3.bf16.msra.mxu0 %v2051_v26  ;;  %v2071_v26 = vpack.c.bf16 %v1689_v25, %v1688_v24  ;;  %v2093_v24 = vpack.c.bf16 %v1705_v20, %v1704_v19  ;;  %v1718_v25 = vld [vmem:[%s2631_s6 + $0xa0] sm:$0xff] }
  0x23   :  { %2098 = vmatprep.subr.bf16.mxu0 %v2097_v55 }
  0x81   :  { %v49_v29 = vpop.permute.xlu0 %48 }
  0x82   :  { %vm53_vm0 = vcmp.eq.s32.totalorder %v46_v28, %v49_v29 }
  0x83   :  { %1875 = vmatprep.mubr.msk.f32.mxu0 %vm53_vm0, %v2224_v30 }
  0x85   :  { %v52_v31 = vpop.permute.xlu0 %51 }
  0x86   :  { %vm54_vm1 = vcmp.eq.s32.totalorder %v46_v28, %v52_v31  ;;  %v1691_v28 = vld [vmem:[%s2631_s6 + $0x98] sm:$0xff]  ;;  %v1677_v31 = vld [vmem:[%s2632_s7] ss:$0 sm:$0xff] }
  0x87   :  { %1876 = vmatmul.mubr.msk.f32.vlgmr.msra.gmra.mrb[0].mxu0 %vm54_vm1, %v2224_v30  ;;  %v2075_v29 = vpack.c.bf16 %v1691_v28, %v1690_v27  ;;  %v1715_v30 = vld [vmem:[%s2632_s7 + $0x3] ss:$0 sm:$0xff]  ;;  %v1720_v28 = vld [vmem:[%s2631_s6 + $0xb0] sm:$0xff] }
  0x88   :  { %2100 = vmatpush3.bf16.msra.mxu0 %v2097_v55  ;;  %v2455_v55 = vld [vmem:[%s2626_s1] sm:$0xff] }
  0x89   :  { %2102 = vmatprep.subr.bf16.mxu0 %v2101_v61 }
  0x8c   :  { %2104 = vmatpush3.bf16.msra.mxu0 %v2101_v61 }
 0x15a   :  { %v1877_v33 = vpop.f32.mrb[0].mxu0 }
 0x15b   :  { %v143_v35 = vpop.f32.mrb[1].mxu0  ;;  %v149_v37 = vadd.f32 %v1877_v33, %v76_v34 }
 0x15c   :  { %v144_v36 = vadd.f32 %v143_v35, %v75_v32 }
 0x15d   :  { %v156_v39 = vsel %vm152_vm2, %v149_v37, 0.0 }
 0x15e   :  { %v153_v38 = vsel %vm152_vm2, %v144_v36, 0.0 }
 0x15f   :  { %154 = vadd.xlane.f32.xlu1 %v153_v38 }
 0x163   :  { %157 = vadd.xlane.f32.xlu1 %v156_v39 }
 0x1ec   :  { %v155_v40 = vpop.xlane.xlu1 %154 }
 0x1ed   :  { %v160_v41 = vmul.f32 0.03125, %v155_v40  ;;  %v1685_v40 = vld [vmem:[%s2632_s7 + $0x2] ss:$0 sm:$0xff] }
 0x1ef   :  { %v162_v42 = vsub.f32 %v144_v36, %v160_v41 }
 0x1f0   :  { %v158_v43 = vpop.xlane.xlu1 %157 }
 0x1f1   :  { %v161_v44 = vmul.f32 0.03125, %v158_v43  ;;  %v164_v45 = vmul.f32 %v162_v42, %v162_v42 }
 0x1f3   :  { %v163_v46 = vsub.f32 %v149_v37, %v161_v44  ;;  %v166_v47 = vsel %vm152_vm2, %v164_v45, 0.0 }
 0x1f4   :  { %167 = vadd.xlane.f32.xlu0 %v166_v47 }
 0x1f5   :  { %v165_v48 = vmul.f32 %v163_v46, %v163_v46 }
 0x1f7   :  { %v169_v49 = vsel %vm152_vm2, %v165_v48, 0.0 }
 0x1f8   :  { %170 = vadd.xlane.f32.xlu1 %v169_v49 }
 0x281   :  { %v168_v1 = vpop.xlane.xlu0 %167 }
 0x282   :  { %v172_v2 = vmul.f32 0.03125, %v168_v1 }
 0x284   :  { %v174_v3 = vadd.f32 1e-12, %v172_v2 }
 0x285   :  { %v171_v4 = vpop.xlane.xlu1 %170 }
 0x286   :  { %2167 = vrsqrt.f32 %v174_v3  ;;  %v173_v5 = vmul.f32 0.03125, %v171_v4 }
 0x288   :  { %v175_v7 = vadd.f32 1e-12, %v173_v5 }
 0x28a   :  { %2169 = vrsqrt.f32 %v175_v7 }
 0x290   :  { %v2168_v12 = vpop.eup %2167 }
 0x291   :  { %v178_v13 = vmul.f32 %v2168_v12, %v162_v42  ;;  %v1703_v12 = vld [vmem:[%s2631_s6 + $0x28] sm:$0xff] }
 0x293   :  { %v184_v15 = vmul.f32 %v183_v11, %v178_v13 }
 0x294   :  { %v2170_v16 = vpop.eup %2169 }
 0x295   :  { %v2398_v17 = vadd.f32 %v189_v14, %v184_v15  ;;  %v179_v18 = vmul.f32 %v2170_v16, %v163_v46  ;;  %v1693_v46 = vld [vmem:[%s2632_s7 + $0x4] ss:$0 sm:$0xff] }
 0x297   :  { %v185_v21 = vmul.f32 %v183_v11, %v179_v18  ;;  %1886 = vmatprep.mubr.msk.f32.mxu1 %vm152_vm2, %v2398_v17  ;;  %1944 = vmatprep.mubr.msk.f32.mxu0 %vm152_vm2, %v2398_v17  ;;  %v1702_v11 = vld [vmem:[%s2631_s6 + $0x20] sm:$0xff] }
 0x298   :  { %v2089_v13 = vpack.c.bf16 %v1703_v12, %v1702_v11 }
 0x299   :  { %v2410_v22 = vadd.f32 %v189_v14, %v185_v21 }
 0x29b   :  { %1887 = vmatmul.mubr.msk.f32.vlgmr.msra.gmra.mrb[0].mxu1 %vm152_vm2, %v2410_v22  ;;  %1945 = vmatmul.mubr.msk.f32.vlgmr.msra.gmra.mrb[2].mxu0 %vm152_vm2, %v2410_v22 }
 0x29c   :  { %2066 = vmatpush3.bf16.msra.mxu1 %v2063_v0  ;;  %1897 = vmatprep.mubr.msk.f32.mxu1 %vm152_vm2, %v2398_v17 }
 0x29d   :  { %2068 = vmatprep.subr.bf16.mxu1 %v2067_v23 }
 0x2a0   :  { %2070 = vmatpush3.bf16.msra.mxu1 %v2067_v23 }
 0x2a1   :  { %2072 = vmatprep.subr.bf16.mxu1 %v2071_v26 }
 0x2a3   :  { %1898 = vmatmul.mubr.msk.f32.vlgmr.msra.gmra.mrb[2].mxu1 %vm152_vm2, %v2410_v22 }
 0x2a4   :  { %2074 = vmatpush3.bf16.msra.mxu1 %v2071_v26  ;;  %1908 = vmatprep.mubr.msk.f32.mxu1 %vm152_vm2, %v2398_v17  ;;  %v1719_v26 = vld [vmem:[%s2631_s6 + $0xa8] sm:$0xff] }
 0x2a5   :  { %2076 = vmatprep.subr.bf16.mxu1 %v2075_v29  ;;  %v2105_v27 = vpack.c.bf16 %v1719_v26, %v1718_v25 }
 0x2a8   :  { %2078 = vmatpush3.bf16.msra.mxu1 %v2075_v29  ;;  %v1721_v29 = vld [vmem:[%s2631_s6 + $0xb8] sm:$0xff] }
 0x2ab   :  { %1909 = vmatmul.mubr.msk.f32.vlgmr.msra.gmra.mrb[4].mxu1 %vm152_vm2, %v2410_v22 }
 0x36e   :  { %v1888_v32 = vpop.f32.mrb[0].mxu1  ;;  %v1946_v33 = vpop.f32.mrb[2].mxu0 }
 0x36f   :  { %v832_v34 = vadd.f32 %v1946_v33, %v1715_v30  ;;  %v277_v35 = vpop.f32.mrb[1].mxu1  ;;  %v826_v36 = vpop.f32.mrb[3].mxu0  ;;  %v283_v51 = vadd.f32 %v1888_v32, %v1677_v31  ;;  %v1707_v33 = vld [vmem:[%s2632_s7 + $0x1] ss:$0 sm:$0xff] }
 0x370   :  { %v278_v37 = vadd.f32 %v1677_v31, %v277_v35  ;;  %v827_v38 = vadd.f32 %v1715_v30, %v826_v36  ;;  %v2109_v30 = vpack.c.bf16 %v1721_v29, %v1720_v28 }
 0x372   :  { %v2113_v39 = vpack.c.bf16 %v832_v34, %v827_v38  ;;  %1915 = vmatprep.mubr.msk.f32.mxu1 %vm462_vm3, %v278_v37  ;;  %v1723_v38 = vld [vmem:[%s2632_s7 + $0x5] ss:$0 sm:$0xff] }
 0x374   :  { %2115 = vmatprep.subr.msk.bf16.mxu0 %vm2080_vm4, %v2113_v39 }
 0x375   :  { %2118 = vmatpush3.bf16.xpose.msk.msra.mxu0 %vm2080_vm4, %v2113_v39 }
 0x376   :  { %v1899_v41 = vpop.f32.mrb[2].mxu1 }
 0x377   :  { %v371_v42 = vadd.f32 %v1899_v41, %v1685_v40  ;;  %v365_v43 = vpop.f32.mrb[3].mxu1 }
 0x378   :  { %v366_v44 = vadd.f32 %v1685_v40, %v365_v43 }
 0x37a   :  { %v2079_v45 = vpack.c.bf16 %v371_v42, %v366_v44 }
 0x37c   :  { %2081 = vmatprep.subr.msk.bf16.mxu1 %vm2080_vm4, %v2079_v45 }
 0x37d   :  { %2084 = vmatpush3.bf16.xpose.msk.msra.mxu1 %vm2080_vm4, %v2079_v45 }
 0x37e   :  { %v1910_v47 = vpop.f32.mrb[4].mxu1 }
 0x37f   :  { %v459_v48 = vadd.f32 %v1910_v47, %v1693_v46  ;;  %v453_v49 = vpop.f32.mrb[5].mxu1 }
 0x380   :  { %v454_v50 = vadd.f32 %v1693_v46, %v453_v49 }
 0x382   :  { %v2085_v52 = vpack.c.bf16 %v459_v48, %v454_v50 }
 0x384   :  { %1916 = vmatmul.mubr.msk.f32.vlgmr.msra.gmra.mrb[6].mxu1 %vm462_vm3, %v283_v51  ;;  %2086 = vmatprep.subr.bf16.mxu1 %v2085_v52 }
 0x385   :  { %2088 = vmatpush3.bf16.msra.mxu1 %v2085_v52 }
 0x386   :  { %2090 = vmatprep.subr.bf16.mxu1 %v2089_v13 }
 0x457   :  { %v1917_v53 = vpop.f32.mrb[6].mxu1 }
 0x458   :  { %v541_v54 = vpop.f32.mrb[7].mxu1  ;;  %v551_v56 = vmul.f32 0.25, %v1917_v53 }
 0x459   :  { %v550_v57 = vmul.f32 0.25, %v541_v54 }
 0x45a   :  { %v553_v61 = vadd.f32 %v551_v56, %v2460_v58 }
 0x45b   :  { %v552_v59 = vadd.f32 %v550_v57, %v2455_v55 }
 0x45c   :  { %v557_v62 = vsel %vm462_vm3, %v553_v61, -inf }
 0x45d   :  { %v554_v60 = vsel %vm462_vm3, %v552_v59, -inf }
 0x45e   :  { %555 = vmax.xlane.f32.xlu1 %v554_v60 }
 0x462   :  { %558 = vmax.xlane.f32.xlu1 %v557_v62 }
 0x4eb   :  { %v556_v63 = vpop.xlane.xlu1 %555 }
 0x4ec   :  { %v560_v0 = vsub.f32 %v552_v59, %v556_v63  ;;  %v1733_v63 = vld [vmem:[%s2633_s8 + $0x18] sm:$0xff] }
 0x4ee   :  { %v562_v1 = vmul.f32 1.442695, %v560_v0 }
 0x4ef   :  { %v559_v2 = vpop.xlane.xlu1 %558 }
 0x4f0   :  { %2171 = vpow2.f32 %v562_v1  ;;  %v561_v3 = vsub.f32 %v553_v61, %v559_v2 }
 0x4f2   :  { %v564_v4 = vmul.f32 1.442695, %v561_v3 }
 0x4f4   :  { %2173 = vpow2.f32 %v564_v4 }
 0x4fa   :  { %v2172_v5 = vpop.eup %2171 }
 0x4fb   :  { %v566_v7 = vsel %vm462_vm3, %v2172_v5, 0.0 }
 0x4fc   :  { %567 = vadd.xlane.f32.xlu1 %v566_v7 }
 0x4fe   :  { %v2174_v8 = vpop.eup %2173 }
 0x4ff   :  { %v569_v10 = vsel %vm462_vm3, %v2174_v8, 0.0 }
 0x500   :  { %570 = vadd.xlane.f32.xlu1 %v569_v10  ;;  %v658_v10 = vld [vmem:[%s2633_s8 + $0x8] sm:$0xff] }
 0x589   :  { %v568_v14 = vpop.xlane.xlu1 %567 }
 0x58a   :  { %2175 = vrcp.f32 %v568_v14  ;;  %v1286_v14 = vsub.s32 2, %v2387_v6 }
 0x58d   :  { %v571_v15 = vpop.xlane.xlu1 %570 }
 0x58e   :  { %2177 = vrcp.f32 %v571_v15  ;;  %v1287_v15 = vrot.slane %v2393_v9, %v1286_v14 }
 0x594   :  { %v2176_v16 = vpop.eup %2175 }
 0x595   :  { %v574_v18 = vmul.f32 %v2176_v16, %v2172_v5 }
 0x597   :  { %1922 = vmatprep.mubr.msk.f32.mxu1 %vm462_vm3, %v574_v18 }
 0x598   :  { %v2178_v21 = vpop.eup %2177 }
 0x599   :  { %v575_v23 = vmul.f32 %v2178_v21, %v2174_v8  ;;  %v657_v8 = vld [vmem:[%s2633_s8] sm:$0xff] }
 0x59a   :  { %v2127_v11 = vpack.c.bf16 %v658_v10, %v657_v8 }
 0x59b   :  { %1923 = vmatmul.mubr.msk.f32.vlgmr.msra.gmra.mrb[8].mxu1 %vm462_vm3, %v575_v23 }
 0x59c   :  { %2092 = vmatpush3.bf16.msra.mxu1 %v2089_v13  ;;  %1933 = vmatprep.mubr.msk.f32.mxu1 %vm152_vm2, %v2398_v17 }
 0x59d   :  { %2094 = vmatprep.subr.bf16.mxu1 %v2093_v24 }
 0x5a0   :  { %2096 = vmatpush3.bf16.msra.mxu1 %v2093_v24 }
 0x5a1   :  { %2106 = vmatprep.subr.bf16.mxu1 %v2105_v27 }
 0x5a3   :  { %1934 = vmatmul.mubr.msk.f32.vlgmr.msra.gmra.mrb[10].mxu1 %vm152_vm2, %v2410_v22 }
 0x5a4   :  { %2108 = vmatpush3.bf16.msra.mxu1 %v2105_v27  ;;  %1955 = vmatprep.mubr.msk.f32.mxu1 %vm152_vm2, %v2398_v17 }
 0x5a5   :  { %2110 = vmatprep.subr.bf16.mxu1 %v2109_v30 }
 0x5a8   :  { %2112 = vmatpush3.bf16.msra.mxu1 %v2109_v30 }
 0x5ab   :  { %1956 = vmatmul.mubr.msk.f32.vlgmr.msra.gmra.mrb[12].mxu1 %vm152_vm2, %v2410_v22 }
 0x66e   :  { %v2502_v31 = vpop.f32.mrb[8].mxu1 }
 0x66f   :  { %v2504_v32 = vpop.f32.mrb[9].mxu1 }
 0x676   :  { %v1935_v34 = vpop.f32.mrb[10].mxu1 }
 0x677   :  { %v738_v35 = vpop.f32.mrb[11].mxu1  ;;  %v744_v37 = vadd.f32 %v1935_v34, %v1707_v33  ;;  %v1328_v34 = vld [vmem:[%s2634_s9] sm:$0xff] }
 0x678   :  { %v739_v36 = vadd.f32 %v1707_v33, %v738_v35  ;;  %v1329_v35 = vld [vmem:[%s2634_s9 + $0x8] sm:$0xff] }
 0x67a   :  { %1962 = vmatprep.mubr.msk.f32.mxu0 %vm462_vm3, %v739_v36  ;;  %v2131_v36 = vpack.c.bf16 %v1329_v35, %v1328_v34 }
 0x67b   :  { %1963 = vmatmul.mubr.msk.f32.vlgmr.msra.gmra.mrb[4].mxu0 %vm462_vm3, %v744_v37  ;;  %v1330_v37 = vld [vmem:[%s2634_s9 + $0x10] sm:$0xff] }
 0x67e   :  { %v1957_v39 = vpop.f32.mrb[12].mxu1 }
 0x67f   :  { %v920_v40 = vadd.f32 %v1957_v39, %v1723_v38  ;;  %v914_v41 = vpop.f32.mrb[13].mxu1 }
 0x680   :  { %v915_v42 = vadd.f32 %v1723_v38, %v914_v41  ;;  %v1331_v38 = vld [vmem:[%s2634_s9 + $0x18] sm:$0xff] }
 0x681   :  { %v2135_v39 = vpack.c.bf16 %v1331_v38, %v1330_v37 }
 0x682   :  { %v2119_v43 = vpack.c.bf16 %v920_v40, %v915_v42 }
 0x684   :  { %2120 = vmatprep.subr.bf16.mxu1 %v2119_v43 }
 0x685   :  { %2122 = vmatpush3.bf16.msra.mxu1 %v2119_v43 }
 0x686   :  { %2132 = vmatprep.subr.bf16.mxu1 %v2131_v36 }
 0x74e   :  { %v1964_v44 = vpop.f32.mrb[4].mxu0 }
 0x74f   :  { %v1001_v45 = vpop.f32.mrb[5].mxu0  ;;  %v1011_v46 = vmul.f32 0.25, %v1964_v44 }
 0x750   :  { %v1010_v47 = vmul.f32 0.25, %v1001_v45 }
 0x751   :  { %v1013_v50 = vadd.f32 %v1011_v46, %v2460_v58  ;;  %v1732_v58 = vld [vmem:[%s2633_s8 + $0x10] sm:$0xff]  ;;  %v1318_v46 = vsub.s32 3, %v2387_v6 }
 0x752   :  { %v1012_v48 = vadd.f32 %v1010_v47, %v2455_v55  ;;  %v2123_v0 = vpack.c.bf16 %v1733_v63, %v1732_v58  ;;  %v1324_v47 = vsub.s32 4, %v2387_v6  ;;  %v1441_v58 = vld [vmem:[%s2636_s11 + $0x18] sm:$0xff] }
 0x753   :  { %v1017_v51 = vsel %vm462_vm3, %v1013_v50, -inf }
 0x754   :  { %v1014_v49 = vsel %vm462_vm3, %v1012_v48, -inf  ;;  %2124 = vmatprep.subr.bf16.mxu0 %v2123_v0 }
 0x755   :  { %1015 = vmax.xlane.f32.xlu1 %v1014_v49  ;;  %2126 = vmatpush3.bf16.msra.mxu0 %v2123_v0  ;;  %v1442_v0 = vld [vmem:[%s2636_s11 + $0x20] sm:$0xff] }
 0x756   :  { %2128 = vmatprep.subr.bf16.mxu0 %v2127_v11 }
 0x759   :  { %1018 = vmax.xlane.f32.xlu1 %v1017_v51 }
 0x7e2   :  { %v1016_v52 = vpop.xlane.xlu1 %1015 }
 0x7e3   :  { %v1020_v53 = vsub.f32 %v1012_v48, %v1016_v52  ;;  %v1319_v48 = vrot.slane %v2393_v9, %v1318_v46 }
 0x7e5   :  { %v1022_v54 = vmul.f32 1.442695, %v1020_v53  ;;  %v1325_v53 = vrot.slane %v2393_v9, %v1324_v47 }
 0x7e6   :  { %v1019_v56 = vpop.xlane.xlu1 %1018 }
 0x7e7   :  { %2179 = vpow2.f32 %v1022_v54  ;;  %v1021_v57 = vsub.f32 %v1013_v50, %v1019_v56 }
 0x7e9   :  { %v1024_v59 = vmul.f32 1.442695, %v1021_v57 }
 0x7eb   :  { %2181 = vpow2.f32 %v1024_v59 }
 0x7f1   :  { %v2180_v60 = vpop.eup %2179 }
 0x7f2   :  { %v1026_v61 = vsel %vm462_vm3, %v2180_v60, 0.0 }
 0x7f3   :  { %1027 = vadd.xlane.f32.xlu1 %v1026_v61  ;;  %v1439_v61 = vld [vmem:[%s2636_s11 + $0x8] sm:$0xff] }
 0x7f5   :  { %v2182_v55 = vpop.eup %2181 }
 0x7f6   :  { %v1029_v62 = vsel %vm462_vm3, %v2182_v55, 0.0 }
 0x7f7   :  { %1030 = vadd.xlane.f32.xlu0 %v1029_v62  ;;  %v1440_v62 = vld [vmem:[%s2636_s11 + $0x10] sm:$0xff] }
 0x7f8   :  { %v2143_v63 = vpack.c.bf16 %v1441_v58, %v1440_v62 }
 0x880   :  { %v1028_v1 = vpop.xlane.xlu1 %1027 }
 0x881   :  { %2183 = vrcp.f32 %v1028_v1  ;;  %v1443_v1 = vld [vmem:[%s2636_s11 + $0x28] sm:$0xff] }
 0x884   :  { %v1031_v2 = vpop.xlane.xlu0 %1030 }
 0x885   :  { %2185 = vrcp.f32 %v1031_v2  ;;  %v2147_v2 = vpack.c.bf16 %v1443_v1, %v1442_v0 }
 0x88b   :  { %v2184_v3 = vpop.eup %2183 }
 0x88c   :  { %v1034_v4 = vmul.f32 %v2184_v3, %v2180_v60  ;;  %v1438_v60 = vld [vmem:[%s2636_s11] sm:$0xff]  ;;  %v1444_v3 = vld [vmem:[%s2636_s11 + $0x30] sm:$0xff] }
 0x88e   :  { %1969 = vmatprep.mubr.msk.f32.mxu1 %vm462_vm3, %v1034_v4  ;;  %v1445_v4 = vld [vmem:[%s2636_s11 + $0x38] sm:$0xff] }
 0x88f   :  { %v2186_v5 = vpop.eup %2185 }
 0x890   :  { %v1035_v7 = vmul.f32 %v2186_v5, %v2182_v55  ;;  %v2139_v55 = vpack.c.bf16 %v1439_v61, %v1438_v60  ;;  %v2151_v5 = vpack.c.bf16 %v1445_v4, %v1444_v3  ;;  %v1562_v60 = vsub.s32 6, %v2387_v6 }
 0x891   :  { %v1568_v61 = vsub.s32 7, %v2387_v6 }
 0x892   :  { %1970 = vmatmul.mubr.msk.f32.vlgmr.msra.gmra.mrb[14].mxu1 %vm462_vm3, %v1035_v7  ;;  %v1738_v7 = vld [vmem:[%s2635_s10] ss:$0 sm:$0xff] }
 0x893   :  { %2134 = vmatpush3.bf16.msra.mxu1 %v2131_v36  ;;  %v1569_v0 = vrot.slane %v2393_v9, %v1568_v61 }
 0x894   :  { %2136 = vmatprep.subr.bf16.mxu1 %v2135_v39 }
 0x897   :  { %2138 = vmatpush3.bf16.msra.mxu1 %v2135_v39 }
 0x965   :  { %v1971_v12 = vpop.f32.mrb[14].mxu1 }
 0x966   :  { %v1108_v13 = vpop.f32.mrb[15].mxu1 }
 0x967   :  { %1976 = vmatprep.mubr.msk.f32.mxu0 %vm462_vm3, %v1108_v13 }
 0x968   :  { %1977 = vmatmul.mubr.msk.f32.vlgmr.msra.gmra.mrb[6].mxu0 %vm462_vm3, %v1971_v12 }
 0x969   :  { %2130 = vmatpush3.bf16.msra.mxu0 %v2127_v11  ;;  %1983 = vmatprep.mubr.msk.f32.mxu0 %vm462_vm3, %v2504_v32 }
 0x96a   :  { %2140 = vmatprep.subr.bf16.mxu0 %v2139_v55 }
 0x970   :  { %1984 = vmatmul.mubr.msk.f32.vlgmr.msra.gmra.mrb[6].mxu0 %vm462_vm3, %v2502_v31 }
 0x971   :  { %2142 = vmatpush3.bf16.msra.mxu0 %v2139_v55  ;;  %v1563_v55 = vrot.slane %v2393_v9, %v1562_v60 }
 0x972   :  { %2144 = vmatprep.subr.bf16.mxu0 %v2143_v63 }
 0x975   :  { %2146 = vmatpush3.bf16.msra.mxu0 %v2143_v63 }
 0x976   :  { %2148 = vmatprep.subr.bf16.mxu0 %v2147_v2 }
 0x979   :  { %2150 = vmatpush3.bf16.msra.mxu0 %v2147_v2 }
 0x97a   :  { %2152 = vmatprep.subr.bf16.mxu0 %v2151_v5 }
 0x97d   :  { %2154 = vmatpush3.bf16.msra.mxu0 %v2151_v5 }
 0xa43   :  { %v1985_v16 = vpop.f32.mrb[6].mxu0 }
 0xa44   :  { %v1283_v18 = vadd.f32 %v1985_v16, %v2410_v22  ;;  %v1273_v19 = vpop.f32.mrb[7].mxu0 }
 0xa45   :  { %v1282_v20 = vadd.f32 %v1273_v19, %v2398_v17 }
 0xa46   :  { %v1289_v21 = vadd.f32 %v1287_v15, %v1283_v18 }
 0xa47   :  { %v1288_v23 = vadd.f32 %v1287_v15, %v1282_v20 }
 0xa48   :  { %v1293_v24 = vsel %vm152_vm2, %v1289_v21, 0.0 }
 0xa49   :  { %1294 = vadd.xlane.f32.xlu0 %v1293_v24  ;;  %v1290_v25 = vsel %vm152_vm2, %v1288_v23, 0.0 }
 0xa4a   :  { %1291 = vadd.xlane.f32.xlu1 %v1290_v25 }
 0xad6   :  { %v1295_v26 = vpop.xlane.xlu0 %1294 }
 0xad7   :  { %v1297_v27 = vmul.f32 0.03125, %v1295_v26  ;;  %v1292_v28 = vpop.xlane.xlu1 %1291 }
 0xad8   :  { %v1296_v29 = vmul.f32 0.03125, %v1292_v28 }
 0xad9   :  { %v1299_v30 = vsub.f32 %v1289_v21, %v1297_v27 }
 0xada   :  { %v1298_v31 = vsub.f32 %v1288_v23, %v1296_v29 }
 0xadb   :  { %v1301_v32 = vmul.f32 %v1299_v30, %v1299_v30 }
 0xadc   :  { %v1300_v33 = vmul.f32 %v1298_v31, %v1298_v31 }
 0xadd   :  { %v1305_v22 = vsel %vm152_vm2, %v1301_v32, 0.0 }
 0xade   :  { %1306 = vadd.xlane.f32.xlu0 %v1305_v22  ;;  %v1302_v17 = vsel %vm152_vm2, %v1300_v33, 0.0  ;;  %v1448_v33 = vsub.s32 5, %v2387_v6 }
 0xadf   :  { %1303 = vadd.xlane.f32.xlu1 %v1302_v17 }
 0xae0   :  { %v1449_v22 = vrot.slane %v2393_v9, %v1448_v33 }
 0xb6b   :  { %v1307_v40 = vpop.xlane.xlu0 %1306 }
 0xb6c   :  { %v1309_v41 = vmul.f32 0.03125, %v1307_v40  ;;  %v1304_v42 = vpop.xlane.xlu1 %1303 }
 0xb6d   :  { %v1308_v43 = vmul.f32 0.03125, %v1304_v42 }
 0xb6e   :  { %v1311_v44 = vadd.f32 1e-12, %v1309_v41 }
 0xb6f   :  { %v1310_v45 = vadd.f32 1e-12, %v1308_v43 }
 0xb70   :  { %2187 = vrsqrt.f32 %v1311_v44 }
 0xb71   :  { %2189 = vrsqrt.f32 %v1310_v45 }
 0xb7a   :  { %v2188_v49 = vpop.eup %2187 }
 0xb7b   :  { %v2190_v50 = vpop.eup %2189  ;;  %v1315_v51 = vmul.f32 %v2188_v49, %v1299_v30 }
 0xb7c   :  { %v1314_v52 = vmul.f32 %v2190_v50, %v1298_v31 }
 0xb7d   :  { %v1321_v54 = vmul.f32 %v1319_v48, %v1315_v51  ;;  %v1572_v51 = vld [vmem:[%s2627_s2] sm:$0xff] }
 0xb7e   :  { %v1320_v56 = vmul.f32 %v1319_v48, %v1314_v52 }
 0xb7f   :  { %v1327_v59 = vadd.f32 %v1325_v53, %v1321_v54 }
 0xb80   :  { %v1326_v57 = vadd.f32 %v1325_v53, %v1320_v56 }
 0xb82   :  { %1994 = vmatprep.mubr.msk.f32.mxu1 %vm152_vm2, %v1326_v57 }
 0xb83   :  { %1995 = vmatmul.mubr.msk.f32.vlgmr.msra.gmra.mrb[16].mxu1 %vm152_vm2, %v1327_v59 }
 0xb84   :  { %2020 = vmatprep.mubr.msk.f32.mxu1 %vm462_vm3, %v1572_v51 }
 0xc56   :  { %v1996_v8 = vpop.f32.mrb[16].mxu1 }
 0xc57   :  { %v1417_v10 = vadd.f32 %v1996_v8, %v1738_v7  ;;  %v1411_v11 = vpop.f32.mrb[17].mxu1  ;;  %v1573_v8 = vld [vmem:[%s2627_s2 + $0x8] sm:$0xff] }
 0xc58   :  { %v1412_v12 = vadd.f32 %v1738_v7, %v1411_v11 }
 0xc59   :  { %v1421_v13 = vmul.f32 %v1417_v10, %v1417_v10 }
 0xc5a   :  { %v1420_v14 = vmul.f32 %v1412_v12, %v1412_v12 }
 0xc5b   :  { %v1423_v15 = vmul.f32 %v1421_v13, %v1417_v10 }
 0xc5c   :  { %v1422_v16 = vmul.f32 %v1420_v14, %v1412_v12 }
 0xc5d   :  { %v1425_v18 = vmul.f32 0.044715, %v1423_v15 }
 0xc5e   :  { %v1424_v19 = vmul.f32 0.044715, %v1422_v16 }
 0xc5f   :  { %v1427_v20 = vadd.f32 %v1425_v18, %v1417_v10 }
 0xc60   :  { %v1426_v21 = vadd.f32 %v1424_v19, %v1412_v12 }
 0xc61   :  { %v1429_v23 = vmul.f32 0.7978846, %v1427_v20 }
 0xc62   :  { %v1428_v24 = vmul.f32 0.7978846, %v1426_v21 }
 0xc63   :  { %2191 = vtanh.f32 %v1429_v23 }
 0xc64   :  { %2193 = vtanh.f32 %v1428_v24 }
 0xc6d   :  { %v2192_v25 = vpop.eup %2191 }
 0xc6e   :  { %v2194_v26 = vpop.eup %2193  ;;  %v1433_v27 = vadd.f32 1.0, %v2192_v25 }
 0xc6f   :  { %v1432_v28 = vadd.f32 1.0, %v2194_v26 }
 0xc70   :  { %v1435_v29 = vmul.f32 0.5, %v1433_v27 }
 0xc71   :  { %v1434_v30 = vmul.f32 0.5, %v1432_v28 }
 0xc72   :  { %v1437_v32 = vmul.f32 %v1435_v29, %v1417_v10 }
 0xc73   :  { %v1436_v31 = vmul.f32 %v1434_v30, %v1412_v12 }
 0xc75   :  { %2013 = vmatprep.mubr.msk.f32.mxu0 %vm1450_vm5, %v1436_v31 }
 0xc76   :  { %2014 = vmatmul.mubr.msk.f32.vlgmr.msra.gmra.mrb[8].mxu0 %vm1450_vm5, %v1437_v32 }
 0xd49   :  { %v2015_v17 = vpop.f32.mrb[8].mxu0 }
 0xd4a   :  { %v1529_v34 = vadd.f32 %v2015_v17, %v1449_v22  ;;  %v1523_v35 = vpop.f32.mrb[9].mxu0 }
 0xd4b   :  { %v1524_v36 = vadd.f32 %v1523_v35, %v1449_v22 }
 0xd4c   :  { %v1533_v37 = vadd.f32 %v1529_v34, %v1327_v59 }
 0xd4d   :  { %v1532_v38 = vadd.f32 %v1524_v36, %v1326_v57 }
 0xd4e   :  { %v1537_v39 = vsel %vm152_vm2, %v1533_v37, 0.0 }
 0xd4f   :  { %1538 = vadd.xlane.f32.xlu0 %v1537_v39  ;;  %v1534_v40 = vsel %vm152_vm2, %v1532_v38, 0.0 }
 0xd50   :  { %1535 = vadd.xlane.f32.xlu1 %v1534_v40 }
 0xddc   :  { %v1539_v41 = vpop.xlane.xlu0 %1538 }
 0xddd   :  { %v1541_v42 = vmul.f32 0.03125, %v1539_v41  ;;  %v1536_v43 = vpop.xlane.xlu1 %1535 }
 0xdde   :  { %v1540_v44 = vmul.f32 0.03125, %v1536_v43 }
 0xddf   :  { %v1543_v45 = vsub.f32 %v1533_v37, %v1541_v42 }
 0xde0   :  { %v1542_v46 = vsub.f32 %v1532_v38, %v1540_v44 }
 0xde1   :  { %v1545_v47 = vmul.f32 %v1543_v45, %v1543_v45 }
 0xde2   :  { %v1544_v48 = vmul.f32 %v1542_v46, %v1542_v46 }
 0xde3   :  { %v1549_v49 = vsel %vm152_vm2, %v1545_v47, 0.0 }
 0xde4   :  { %1550 = vadd.xlane.f32.xlu0 %v1549_v49  ;;  %v1546_v50 = vsel %vm152_vm2, %v1544_v48, 0.0 }
 0xde5   :  { %1547 = vadd.xlane.f32.xlu1 %v1546_v50 }
 0xe71   :  { %v1551_v52 = vpop.xlane.xlu0 %1550 }
 0xe72   :  { %v1553_v53 = vmul.f32 0.03125, %v1551_v52  ;;  %v1548_v54 = vpop.xlane.xlu1 %1547 }
 0xe73   :  { %v1552_v56 = vmul.f32 0.03125, %v1548_v54 }
 0xe74   :  { %v1555_v57 = vadd.f32 1e-12, %v1553_v53 }
 0xe75   :  { %v1554_v59 = vadd.f32 1e-12, %v1552_v56 }
 0xe76   :  { %2195 = vrsqrt.f32 %v1555_v57 }
 0xe77   :  { %2197 = vrsqrt.f32 %v1554_v59 }
 0xe80   :  { %v2196_v62 = vpop.eup %2195 }
 0xe81   :  { %v2198_v58 = vpop.eup %2197  ;;  %v1559_v63 = vmul.f32 %v2196_v62, %v1543_v45 }
 0xe82   :  { %v1558_v1 = vmul.f32 %v2198_v58, %v1542_v46 }
 0xe83   :  { %v1565_v2 = vmul.f32 %v1563_v55, %v1559_v63 }
 0xe84   :  { %v1564_v3 = vmul.f32 %v1563_v55, %v1558_v1 }
 0xe85   :  { %v1571_v4 = vadd.f32 %v1569_v0, %v1565_v2 }
 0xe86   :  { %v1570_v5 = vadd.f32 %v1569_v0, %v1564_v3 }
 0xe88   :  { %v2155_v7 = vpack.c.bf16 %v1571_v4, %v1570_v5 }
 0xe8a   :  { %2156 = vmatprep.subr.bf16.mxu1 %v2155_v7 }
 0xe8b   :  { %2158 = vmatpush3.bf16.msra.mxu1 %v2155_v7 }
 0xe8e   :  { %2021 = vmatmul.mubr.msk.f32.vlgmr.msra.gmra.mrb[18].mxu1 %vm462_vm3, %v1573_v8 }
 0xf61   :  { %v2022_v6 = vpop.f32.mrb[18].mxu1 }
 0xf62   :  { %1656 = vst.msk [vmem:[#allocation2 + $0x8] sm:$0xff] %vm152_vm2, %v2022_v6  ;;  %v1646_v9 = vpop.f32.mrb[19].mxu1 }
 0xf63   :  { %1655 = vst.msk [vmem:[#allocation2] sm:$0xff] %vm152_vm2, %v1646_v9 }
 0xf64   :  { %2210 = shalt.err (!%p2207_p4)
}
 0xf65   :  { %s2211_s29 = scalar_lea.hbm %s2637_s12, 256 }
 0xf66   :  { %p2212_p5 = scmp.ne.s32.totalorder %s2637_s12, %s2211_s29  ;;  %p2215_p6 = scmp.lt.u32.totalorder %s2211_s29, %s2637_s12 }
 0xf68   :  { %p2217_p7 = pnand %p2215_p6, %p2212_p5 }
 0xf6a   :  { %2220 = shalt.err (!%p2217_p7)
}
 0xf6b   :  { %s2226_s15 = smov 128   ;;  %s2227_s16 = smov 8  }
 0xf6c   :  { %1668 = dma.vmem_to_hbm [thread:$0]  %s1663_s26, 256, %s2637_s12, [#allocation3], %s2226_s15, %s2226_s15, %s2227_s16  }
 0xf6d   :  { %2221 = dma.done.wait [#allocation3], 256  }
 0xf6e   :  { %2222 = vsyncadd [#allocation3], 4294967040 }
 0xf6f   :  { %1672 = vsyncpa [#allocation3], 1 }

</bundles_post_ra>
